<compile_context>
chip_gen: v5e
topology: v5e:2x2
jax: 0.10.0
libtpu: 0.0.40
codegen_flags: <defaults>
</compile_context>

<pallas_src>
import jax
import jax.numpy as jnp
from jax.experimental import pallas as pl
from jax.experimental.pallas import tpu as pltpu

D_IN, D_HID, D_OUT = 2, 256, 2
D_IN_PAD, D_OUT_PAD = 128, 128          # lane-dense (multiple of 128) padding


# ----------------------------- Pallas kernel ------------------------------- #

def _mlp_kernel(x_ref, w1_ref, b1_ref, w2_ref, b2_ref,
                w3_ref, b3_ref, w4_ref, b4_ref, o_ref):
    """Fused fc1+relu, fc2+relu, fc3+relu, linear on one (tile_m, 128) tile."""
    h = x_ref[...]                                                 # bf16
    h = jnp.dot(h, w1_ref[...], preferred_element_type=jnp.float32) + b1_ref[...]
    h = jnp.maximum(h, 0.0).astype(jnp.bfloat16)
    h = jnp.dot(h, w2_ref[...], preferred_element_type=jnp.float32) + b2_ref[...]
    h = jnp.maximum(h, 0.0).astype(jnp.bfloat16)
    h = jnp.dot(h, w3_ref[...], preferred_element_type=jnp.float32) + b3_ref[...]
    h = jnp.maximum(h, 0.0).astype(jnp.bfloat16)
    y = jnp.dot(h, w4_ref[...], preferred_element_type=jnp.float32) + b4_ref[...]
    o_ref[...] = y.astype(o_ref.dtype)


# ------------------------------ JAX wrapper -------------------------------- #

def _round_up(a, b):
    return (a + b - 1) // b * b


def init_params(key):
    """PyTorch nn.Linear-style init; weights stored matmul-form (in, out), f32."""
    ks = jax.random.split(key, 8)

    def linear(kw, kb, fan_in, fan_out):
        bound = 1.0 / float(jnp.sqrt(float(fan_in)))
        w = jax.random.uniform(kw, (fan_in, fan_out), jnp.float32, -bound, bound)
        b = jax.random.uniform(kb, (fan_out,), jnp.float32, -bound, bound)
        return w, b

    p = {}
    p["w1"], p["b1"] = linear(ks[0], ks[1], D_IN, D_HID)
    p["w2"], p["b2"] = linear(ks[2], ks[3], D_HID, D_HID)
    p["w3"], p["b3"] = linear(ks[4], ks[5], D_HID, D_HID)
    p["w4"], p["b4"] = linear(ks[6], ks[7], D_HID, D_OUT)
    return p


def _pack_params(p):
    """Zero-pad edge layers to 128-multiples; cast matmul operands to bf16."""
    w1 = jnp.zeros((D_IN_PAD, D_HID), jnp.float32).at[:D_IN, :].set(p["w1"])
    w4 = jnp.zeros((D_HID, D_OUT_PAD), jnp.float32).at[:, :D_OUT].set(p["w4"])
    b4 = jnp.zeros((D_OUT_PAD,), jnp.float32).at[:D_OUT].set(p["b4"])
    return (w1.astype(jnp.bfloat16), p["b1"].reshape(1, D_HID),
            p["w2"].astype(jnp.bfloat16), p["b2"].reshape(1, D_HID),
            p["w3"].astype(jnp.bfloat16), p["b3"].reshape(1, D_HID),
            w4.astype(jnp.bfloat16), b4.reshape(1, D_OUT_PAD))


def mlp_forward(params, x, *, tile_m=512):
    m, k = x.shape
    assert k == D_IN
    tile_m = min(tile_m, _round_up(m, 8))          # multiple of 8 sublanes
    m_pad = _round_up(m, tile_m)
    grid = (m_pad // tile_m,)

    # lane-dense, zero-padded, bf16 input slab
    xp = jnp.zeros((m_pad, D_IN_PAD), jnp.bfloat16)
    xp = xp.at[:m, :D_IN].set(x.astype(jnp.bfloat16))

    w1, b1, w2, b2, w3, b3, w4, b4 = _pack_params(params)

    def row_spec(shape):                 # tiled over the batch (M) axis
        return pl.BlockSpec(shape, lambda i: (i, 0))

    def full_spec(arr):                  # weights/bias: resident across steps
        return pl.BlockSpec(arr.shape, lambda i: (0, 0))

    flops = 2 * m_pad * (D_IN_PAD * D_HID + 2 * D_HID * D_HID
                         + D_HID * D_OUT_PAD)
    bytes_accessed = (
        xp.size * 2
        + sum(int(a.size) * a.dtype.itemsize
              for a in (w1, b1, w2, b2, w3, b3, w4, b4))
        + m_pad * D_OUT_PAD * 4)

    out = pl.pallas_call(
        _mlp_kernel,
        out_shape=jax.ShapeDtypeStruct((m_pad, D_OUT_PAD), jnp.float32),
        grid=grid,
        in_specs=[row_spec((tile_m, D_IN_PAD)),
                  full_spec(w1), full_spec(b1),
                  full_spec(w2), full_spec(b2),
                  full_spec(w3), full_spec(b3),
                  full_spec(w4), full_spec(b4)],
        out_specs=row_spec((tile_m, D_OUT_PAD)),
        compiler_params=pltpu.CompilerParams(
            dimension_semantics=("parallel",),
            vmem_limit_bytes=32 * 1024 * 1024),
        cost_estimate=pl.CostEstimate(flops=flops, transcendentals=0,
                                      bytes_accessed=bytes_accessed),
    )(xp, w1, b1, w2, b2, w3, b3, w4, b4)

    return out[:m, :D_OUT]


# --------------------------- pure-JAX reference ----------------------------- #

def _ref_forward(p, x):
    h = jax.nn.relu(x @ p["w1"] + p["b1"])
    h = jax.nn.relu(h @ p["w2"] + p["b2"])
    h = jax.nn.relu(h @ p["w3"] + p["b3"])
    return h @ p["w4"] + p["b4"]


if __name__ == "__main__":
    key = jax.random.PRNGKey(0)
    kx, kp = jax.random.split(key)

    BATCH = 8                                   # x: (batch, 2) per the module
    x = jax.random.normal(kx, (BATCH, D_IN), jnp.float32)
    params = init_params(kp)

    out = jax.jit(mlp_forward)(params, x)
    out = jax.block_until_ready(out)

    ref = _ref_forward(params, x)
    assert out.shape == ref.shape == (BATCH, D_OUT)
    max_err = float(jnp.max(jnp.abs(out - ref)))
    # bf16 MXU operands with f32 accumulation vs. full-f32 reference
    assert jnp.allclose(out, ref, atol=5e-2, rtol=5e-2), max_err

    print("KERNEL_OK")
</pallas_src>

<mosaic_0001>
module attributes {stable_mosaic.version = 11 : i64} {
  func.func @_mlp_kernel(%arg0: i32, %arg1: memref<8x128xbf16, #tpu.memory_space<vmem>>, %arg2: memref<128x256xbf16, #tpu.memory_space<vmem>>, %arg3: memref<1x256xf32, #tpu.memory_space<vmem>>, %arg4: memref<256x256xbf16, #tpu.memory_space<vmem>>, %arg5: memref<1x256xf32, #tpu.memory_space<vmem>>, %arg6: memref<256x256xbf16, #tpu.memory_space<vmem>>, %arg7: memref<1x256xf32, #tpu.memory_space<vmem>>, %arg8: memref<256x128xbf16, #tpu.memory_space<vmem>>, %arg9: memref<1x128xf32, #tpu.memory_space<vmem>>, %arg10: memref<8x128xf32, #tpu.memory_space<vmem>>) attributes {dimension_semantics = [#tpu.dimension_semantics<parallel>], iteration_bounds = array<i64: 1>, scalar_prefetch = 0 : i64, scratch_operands = 0 : i64, tpu.core_type = #tpu.core_type<tc>, window_params = [{transform_indices = @transform_0, window_bounds = array<i64: 8, 128>}, {pipeline_mode = #tpu.pipeline_mode<synchronous>, transform_indices = @transform_1, window_bounds = array<i64: 128, 256>}, {pipeline_mode = #tpu.pipeline_mode<synchronous>, transform_indices = @transform_2, window_bounds = array<i64: 1, 256>}, {pipeline_mode = #tpu.pipeline_mode<synchronous>, transform_indices = @transform_3, window_bounds = array<i64: 256, 256>}, {pipeline_mode = #tpu.pipeline_mode<synchronous>, transform_indices = @transform_4, window_bounds = array<i64: 1, 256>}, {pipeline_mode = #tpu.pipeline_mode<synchronous>, transform_indices = @transform_5, window_bounds = array<i64: 256, 256>}, {pipeline_mode = #tpu.pipeline_mode<synchronous>, transform_indices = @transform_6, window_bounds = array<i64: 1, 256>}, {pipeline_mode = #tpu.pipeline_mode<synchronous>, transform_indices = @transform_7, window_bounds = array<i64: 256, 128>}, {pipeline_mode = #tpu.pipeline_mode<synchronous>, transform_indices = @transform_8, window_bounds = array<i64: 1, 128>}, {transform_indices = @transform_9, window_bounds = array<i64: 8, 128>}]} {
    %c0 = arith.constant 0 : index
    %c0_0 = arith.constant 0 : index
    %0 = vector.load %arg1[%c0, %c0_0] : memref<8x128xbf16, #tpu.memory_space<vmem>>, vector<8x128xbf16>
    %c0_1 = arith.constant 0 : index
    %c0_2 = arith.constant 0 : index
    %1 = vector.load %arg2[%c0_1, %c0_2] : memref<128x256xbf16, #tpu.memory_space<vmem>>, vector<128x256xbf16>
    %cst = arith.constant dense<0.000000e+00> : vector<8x256xf32>
    %2 = tpu.matmul %0, %1, %cst {dimension_numbers = #tpu.dot_dimension_numbers<[1], [0], [0], [1], [0, 0, 1, 1], [], []>} : vector<8x128xbf16>, vector<128x256xbf16>, vector<8x256xf32> -> vector<8x256xf32>
    %c0_3 = arith.constant 0 : index
    %c0_4 = arith.constant 0 : index
    %3 = vector.load %arg3[%c0_3, %c0_4] : memref<1x256xf32, #tpu.memory_space<vmem>>, vector<1x256xf32>
    %4 = vector.broadcast %3 : vector<1x256xf32> to vector<8x256xf32>
    %5 = arith.addf %2, %4 : vector<8x256xf32>
    %cst_5 = arith.constant 0.000000e+00 : f32
    %6 = vector.broadcast %cst_5 : f32 to vector<8x256xf32>
    %7 = arith.maximumf %5, %6 : vector<8x256xf32>
    %8 = arith.truncf %7 : vector<8x256xf32> to vector<8x256xbf16>
    %c0_6 = arith.constant 0 : index
    %c0_7 = arith.constant 0 : index
    %9 = vector.load %arg4[%c0_6, %c0_7] : memref<256x256xbf16, #tpu.memory_space<vmem>>, vector<256x256xbf16>
    %cst_8 = arith.constant dense<0.000000e+00> : vector<8x256xf32>
    %10 = tpu.matmul %8, %9, %cst_8 {dimension_numbers = #tpu.dot_dimension_numbers<[1], [0], [0], [1], [0, 0, 1, 1], [], []>} : vector<8x256xbf16>, vector<256x256xbf16>, vector<8x256xf32> -> vector<8x256xf32>
    %c0_9 = arith.constant 0 : index
    %c0_10 = arith.constant 0 : index
    %11 = vector.load %arg5[%c0_9, %c0_10] : memref<1x256xf32, #tpu.memory_space<vmem>>, vector<1x256xf32>
    %12 = vector.broadcast %11 : vector<1x256xf32> to vector<8x256xf32>
    %13 = arith.addf %10, %12 : vector<8x256xf32>
    %cst_11 = arith.constant 0.000000e+00 : f32
    %14 = vector.broadcast %cst_11 : f32 to vector<8x256xf32>
    %15 = arith.maximumf %13, %14 : vector<8x256xf32>
    %16 = arith.truncf %15 : vector<8x256xf32> to vector<8x256xbf16>
    %c0_12 = arith.constant 0 : index
    %c0_13 = arith.constant 0 : index
    %17 = vector.load %arg6[%c0_12, %c0_13] : memref<256x256xbf16, #tpu.memory_space<vmem>>, vector<256x256xbf16>
    %cst_14 = arith.constant dense<0.000000e+00> : vector<8x256xf32>
    %18 = tpu.matmul %16, %17, %cst_14 {dimension_numbers = #tpu.dot_dimension_numbers<[1], [0], [0], [1], [0, 0, 1, 1], [], []>} : vector<8x256xbf16>, vector<256x256xbf16>, vector<8x256xf32> -> vector<8x256xf32>
    %c0_15 = arith.constant 0 : index
    %c0_16 = arith.constant 0 : index
    %19 = vector.load %arg7[%c0_15, %c0_16] : memref<1x256xf32, #tpu.memory_space<vmem>>, vector<1x256xf32>
    %20 = vector.broadcast %19 : vector<1x256xf32> to vector<8x256xf32>
    %21 = arith.addf %18, %20 : vector<8x256xf32>
    %cst_17 = arith.constant 0.000000e+00 : f32
    %22 = vector.broadcast %cst_17 : f32 to vector<8x256xf32>
    %23 = arith.maximumf %21, %22 : vector<8x256xf32>
    %24 = arith.truncf %23 : vector<8x256xf32> to vector<8x256xbf16>
    %c0_18 = arith.constant 0 : index
    %c0_19 = arith.constant 0 : index
    %25 = vector.load %arg8[%c0_18, %c0_19] : memref<256x128xbf16, #tpu.memory_space<vmem>>, vector<256x128xbf16>
    %cst_20 = arith.constant dense<0.000000e+00> : vector<8x128xf32>
    %26 = tpu.matmul %24, %25, %cst_20 {dimension_numbers = #tpu.dot_dimension_numbers<[1], [0], [0], [1], [0, 0, 1, 1], [], []>} : vector<8x256xbf16>, vector<256x128xbf16>, vector<8x128xf32> -> vector<8x128xf32>
    %c0_21 = arith.constant 0 : index
    %c0_22 = arith.constant 0 : index
    %27 = vector.load %arg9[%c0_21, %c0_22] : memref<1x128xf32, #tpu.memory_space<vmem>>, vector<1x128xf32>
    %28 = vector.broadcast %27 : vector<1x128xf32> to vector<8x128xf32>
    %29 = arith.addf %26, %28 : vector<8x128xf32>
    %c0_23 = arith.constant 0 : index
    %c0_24 = arith.constant 0 : index
    %30 = vector.load %arg10[%c0_23, %c0_24] : memref<8x128xf32, #tpu.memory_space<vmem>>, vector<8x128xf32>
    tpu.vector_store %arg10[%c0_23, %c0_24], %29 {strides = array<i32>} : memref<8x128xf32, #tpu.memory_space<vmem>>, vector<8x128xf32>,
    return
  }
  func.func @transform_0(%arg0: i32) -> (i32, i32) {
    %c0_i32 = arith.constant 0 : i32
    %c0_i32_0 = arith.constant 0 : i32
    return %arg0, %c0_i32 : i32, i32
  }
  func.func @transform_1(%arg0: i32) -> (i32, i32) {
    %c0_i32 = arith.constant 0 : i32
    %c0_i32_0 = arith.constant 0 : i32
    %c0_i32_1 = arith.constant 0 : i32
    return %c0_i32, %c0_i32_0 : i32, i32
  }
  func.func @transform_2(%arg0: i32) -> (i32, i32) {
    %c0_i32 = arith.constant 0 : i32
    %c0_i32_0 = arith.constant 0 : i32
    %c0_i32_1 = arith.constant 0 : i32
    return %c0_i32, %c0_i32_0 : i32, i32
  }
  func.func @transform_3(%arg0: i32) -> (i32, i32) {
    %c0_i32 = arith.constant 0 : i32
    %c0_i32_0 = arith.constant 0 : i32
    %c0_i32_1 = arith.constant 0 : i32
    return %c0_i32, %c0_i32_0 : i32, i32
  }
  func.func @transform_4(%arg0: i32) -> (i32, i32) {
    %c0_i32 = arith.constant 0 : i32
    %c0_i32_0 = arith.constant 0 : i32
    %c0_i32_1 = arith.constant 0 : i32
    return %c0_i32, %c0_i32_0 : i32, i32
  }
  func.func @transform_5(%arg0: i32) -> (i32, i32) {
    %c0_i32 = arith.constant 0 : i32
    %c0_i32_0 = arith.constant 0 : i32
    %c0_i32_1 = arith.constant 0 : i32
    return %c0_i32, %c0_i32_0 : i32, i32
  }
  func.func @transform_6(%arg0: i32) -> (i32, i32) {
    %c0_i32 = arith.constant 0 : i32
    %c0_i32_0 = arith.constant 0 : i32
    %c0_i32_1 = arith.constant 0 : i32
    return %c0_i32, %c0_i32_0 : i32, i32
  }
  func.func @transform_7(%arg0: i32) -> (i32, i32) {
    %c0_i32 = arith.constant 0 : i32
    %c0_i32_0 = arith.constant 0 : i32
    %c0_i32_1 = arith.constant 0 : i32
    return %c0_i32, %c0_i32_0 : i32, i32
  }
  func.func @transform_8(%arg0: i32) -> (i32, i32) {
    %c0_i32 = arith.constant 0 : i32
    %c0_i32_0 = arith.constant 0 : i32
    %c0_i32_1 = arith.constant 0 : i32
    return %c0_i32, %c0_i32_0 : i32, i32
  }
  func.func @transform_9(%arg0: i32) -> (i32, i32) {
    %c0_i32 = arith.constant 0 : i32
    %c0_i32_0 = arith.constant 0 : i32
    return %arg0, %c0_i32 : i32, i32
  }
}

</mosaic_0001>

<bundles_post_ra>
// kernel: mlp_forward.1
= control target key start
LH: loop header
LB: loop body
LE: loop exit
PB: predicated region body
PF: predicated region fallthrough
CT: control target
= control target key end

     0   :  { %s1913_s1 = inlined_call_operand.vmem [shape: bf16[128,256], index: 1, kind: input, shape index: {}]   ;;  %s1914_s3 = inlined_call_operand.vmem [shape: bf16[256,256], index: 3, kind: input, shape index: {}]   ;;  %s1915_s0 = inlined_call_operand.vmem [shape: bf16[8,128], index: 0, kind: input, shape index: {}]   ;;  %s1916_s5 = inlined_call_operand.vmem [shape: bf16[256,256], index: 5, kind: input, shape index: {}]   ;;  %s1917_s2 = inlined_call_operand.vmem [shape: f32[1,256], index: 2, kind: input, shape index: {}]   ;;  %s1918_s7 = inlined_call_operand.vmem [shape: bf16[256,128], index: 7, kind: input, shape index: {}]   ;;  %s1919_s4 = inlined_call_operand.vmem [shape: f32[1,256], index: 4, kind: input, shape index: {}]   ;;  %s1920_s6 = inlined_call_operand.vmem [shape: f32[1,256], index: 6, kind: input, shape index: {}]   ;;  %s1921_s8 = inlined_call_operand.vmem [shape: f32[1,128], index: 8, kind: input, shape index: {}]   ;;  %s1922_s9 = inlined_call_operand.vmem [shape: f32[8,128], index: 9, kind: output, shape index: {}]  }
   0x1   :  { %v894_v0 = vld [vmem:[%s1913_s1 + $0x70] sm:$0xf]  ;;  %v1235_v1 = vld [vmem:[%s1913_s1 + $0x74] sm:$0xf0]  ;;  %v1234_v2 = vld [vmem:[%s1913_s1 + $0x74] sm:$0xf] }
   0x2   :  { %v895_v3 = vor.u32 %v1235_v1, %v894_v0  ;;  %v896_v4 = vld [vmem:[%s1913_s1 + $0x78] sm:$0xf0]  ;;  %v886_v5 = vld [vmem:[%s1913_s1 + $0x60] sm:$0xf]  ;;  %v1233_v6 = vld [vmem:[%s1913_s1 + $0x64] sm:$0xf0] }
   0x3   :  { %v899_v7 = vor.u32 %v1234_v2, %v896_v4  ;;  %v1232_v8 = vld [vmem:[%s1913_s1 + $0x64] sm:$0xf]  ;;  %v888_v9 = vld [vmem:[%s1913_s1 + $0x68] sm:$0xf0]  ;;  %v887_v10 = vor.u32 %v1233_v6, %v886_v5  ;;  %v878_v12 = vld [vmem:[%s1913_s1 + $0x50] sm:$0xf] }
   0x4   :  { %135 = vmatpush.bf16.msra.mxu0 %v895_v3  ;;  %v891_v11 = vor.u32 %v1232_v8, %v888_v9  ;;  %v1231_v13 = vld [vmem:[%s1913_s1 + $0x54] sm:$0xf0]  ;;  %v1230_v14 = vld [vmem:[%s1913_s1 + $0x54] sm:$0xf]  ;;  %v880_v15 = vld [vmem:[%s1913_s1 + $0x58] sm:$0xf0] }
   0x5   :  { %148 = vmatpush.bf16.msra.mxu1 %v899_v7  ;;  %v879_v16 = vor.u32 %v1231_v13, %v878_v12  ;;  %v883_v17 = vor.u32 %v1230_v14, %v880_v15  ;;  %v870_v18 = vld [vmem:[%s1913_s1 + $0x40] sm:$0xf]  ;;  %v1229_v19 = vld [vmem:[%s1913_s1 + $0x44] sm:$0xf0]  ;;  %v1228_v20 = vld [vmem:[%s1913_s1 + $0x44] sm:$0xf] }
   0x6   :  { %v872_v21 = vld [vmem:[%s1913_s1 + $0x48] sm:$0xf0]  ;;  %v871_v22 = vor.u32 %v1229_v19, %v870_v18  ;;  %v958_v23 = vld [vmem:[%s1914_s3 + $0x70] sm:$0xf]  ;;  %v1251_v24 = vld [vmem:[%s1914_s3 + $0x74] sm:$0xf0] }
   0x7   :  { %v1022_v25 = vld [vmem:[%s1914_s3 + $0xf0] sm:$0xf]  ;;  %v875_v26 = vor.u32 %v1228_v20, %v872_v21  ;;  %v1227_v28 = vld [vmem:[%s1913_s1 + $0x34] sm:$0xf0]  ;;  %v959_v29 = vor.u32 %v1251_v24, %v958_v23  ;;  %v1226_v31 = vld [vmem:[%s1913_s1 + $0x34] sm:$0xf] }
   0x8   :  { %136 = vmatpush.bf16.msra.mxu0 %v887_v10  ;;  %v862_v27 = vld [vmem:[%s1913_s1 + $0x30] sm:$0xf]  ;;  %v1267_v30 = vld [vmem:[%s1914_s3 + $0xf4] sm:$0xf0]  ;;  %v864_v32 = vld [vmem:[%s1913_s1 + $0x38] sm:$0xf0] }
   0x9   :  { %149 = vmatpush.bf16.msra.mxu1 %v891_v11  ;;  %v1023_v33 = vor.u32 %v1267_v30, %v1022_v25  ;;  %v950_v34 = vld [vmem:[%s1914_s3 + $0x60] sm:$0xf]  ;;  %363 = vmatpush.bf16.msra.mxu2 %v959_v29  ;;  %v1249_v35 = vld [vmem:[%s1914_s3 + $0x64] sm:$0xf0]  ;;  %v863_v38 = vor.u32 %v1227_v28, %v862_v27  ;;  %v867_v43 = vor.u32 %v1226_v31, %v864_v32  ;;  %v1224_v44 = vld [vmem:[%s1913_s1 + $0x24] sm:$0xf] }
   0xa   :  { %v1014_v36 = vld [vmem:[%s1914_s3 + $0xe0] sm:$0xf]  ;;  %v1265_v37 = vld [vmem:[%s1914_s3 + $0xe4] sm:$0xf0]  ;;  %v951_v41 = vor.u32 %v1249_v35, %v950_v34  ;;  %v942_v45 = vld [vmem:[%s1914_s3 + $0x50] sm:$0xf] }
   0xb   :  { %v854_v39 = vld [vmem:[%s1913_s1 + $0x20] sm:$0xf]  ;;  %v1225_v40 = vld [vmem:[%s1913_s1 + $0x24] sm:$0xf0]  ;;  %376 = vmatpush.bf16.msra.mxu3 %v1023_v33  ;;  %v1015_v42 = vor.u32 %v1265_v37, %v1014_v36  ;;  %v1247_v46 = vld [vmem:[%s1914_s3 + $0x54] sm:$0xf0] }
   0xc   :  { %137 = vmatpush.bf16.msra.mxu0 %v879_v16  ;;  %v856_v47 = vld [vmem:[%s1913_s1 + $0x28] sm:$0xf0]  ;;  %v1006_v48 = vld [vmem:[%s1914_s3 + $0xd0] sm:$0xf]  ;;  %v1263_v49 = vld [vmem:[%s1914_s3 + $0xd4] sm:$0xf0]  ;;  %v943_v50 = vor.u32 %v1247_v46, %v942_v45  ;;  %v855_v51 = vor.u32 %v1225_v40, %v854_v39 }
   0xd   :  { %150 = vmatpush.bf16.msra.mxu1 %v883_v17  ;;  %364 = vmatpush.bf16.msra.mxu2 %v951_v41  ;;  %v846_v52 = vld [vmem:[%s1913_s1 + $0x10] sm:$0xf]  ;;  %v1007_v53 = vor.u32 %v1263_v49, %v1006_v48  ;;  %v934_v54 = vld [vmem:[%s1914_s3 + $0x40] sm:$0xf]  ;;  %v1245_v55 = vld [vmem:[%s1914_s3 + $0x44] sm:$0xf0]  ;;  %v859_v56 = vor.u32 %v1224_v44, %v856_v47 }
   0xe   :  { %v1223_v57 = vld [vmem:[%s1913_s1 + $0x14] sm:$0xf0]  ;;  %v998_v58 = vld [vmem:[%s1914_s3 + $0xc0] sm:$0xf]  ;;  %v1261_v59 = vld [vmem:[%s1914_s3 + $0xc4] sm:$0xf0]  ;;  %v935_v63 = vor.u32 %v1245_v55, %v934_v54 }
   0xf   :  { %377 = vmatpush.bf16.msra.mxu3 %v1015_v42  ;;  %v1222_v60 = vld [vmem:[%s1913_s1 + $0x14] sm:$0xf]  ;;  %v848_v61 = vld [vmem:[%s1913_s1 + $0x18] sm:$0xf0]  ;;  %v838_v62 = vld [vmem:[%s1913_s1] sm:$0xf]  ;;  %v847_v0 = vor.u32 %v1223_v57, %v846_v52  ;;  %v999_v2 = vor.u32 %v1261_v59, %v998_v58 }
  0x10   :  { %138 = vmatpush.bf16.msra.mxu0 %v871_v22  ;;  %v1221_v1 = vld [vmem:[%s1913_s1 + $0x4] sm:$0xf0]  ;;  %v926_v3 = vld [vmem:[%s1914_s3 + $0x30] sm:$0xf]  ;;  %v1243_v4 = vld [vmem:[%s1914_s3 + $0x34] sm:$0xf0]  ;;  %v851_v5 = vor.u32 %v1222_v60, %v848_v61 }
  0x11   :  { %151 = vmatpush.bf16.msra.mxu1 %v875_v26  ;;  %365 = vmatpush.bf16.msra.mxu2 %v943_v50  ;;  %v1220_v6 = vld [vmem:[%s1913_s1 + $0x4] sm:$0xf]  ;;  %v990_v7 = vld [vmem:[%s1914_s3 + $0xb0] sm:$0xf]  ;;  %v1259_v8 = vld [vmem:[%s1914_s3 + $0xb4] sm:$0xf0]  ;;  %v927_v14 = vor.u32 %v1243_v4, %v926_v3  ;;  %v839_v15 = vor.u32 %v1221_v1, %v838_v62 }
  0x12   :  { %v840_v9 = vld [vmem:[%s1913_s1 + $0x8] sm:$0xf0]  ;;  %v1250_v10 = vld [vmem:[%s1914_s3 + $0x74] sm:$0xf]  ;;  %v960_v11 = vld [vmem:[%s1914_s3 + $0x78] sm:$0xf0]  ;;  %v991_v16 = vor.u32 %v1259_v8, %v990_v7 }
  0x13   :  { %378 = vmatpush.bf16.msra.mxu3 %v1007_v53  ;;  %v1266_v12 = vld [vmem:[%s1914_s3 + $0xf4] sm:$0xf]  ;;  %v1024_v13 = vld [vmem:[%s1914_s3 + $0xf8] sm:$0xf0]  ;;  %v918_v17 = vld [vmem:[%s1914_s3 + $0x20] sm:$0xf]  ;;  %v843_v19 = vor.u32 %v1220_v6, %v840_v9  ;;  %v963_v20 = vor.u32 %v1250_v10, %v960_v11 }
  0x14   :  { %139 = vmatpush.bf16.msra.mxu0 %v863_v38  ;;  %v1241_v18 = vld [vmem:[%s1914_s3 + $0x24] sm:$0xf0]  ;;  %v982_v21 = vld [vmem:[%s1914_s3 + $0xa0] sm:$0xf]  ;;  %v1027_v23 = vor.u32 %v1266_v12, %v1024_v13  ;;  %v1248_v24 = vld [vmem:[%s1914_s3 + $0x64] sm:$0xf] }
  0x15   :  { %152 = vmatpush.bf16.msra.mxu1 %v867_v43  ;;  %366 = vmatpush.bf16.msra.mxu2 %v935_v63  ;;  %v1257_v22 = vld [vmem:[%s1914_s3 + $0xa4] sm:$0xf0]  ;;  %v952_v25 = vld [vmem:[%s1914_s3 + $0x68] sm:$0xf0]  ;;  %v1264_v26 = vld [vmem:[%s1914_s3 + $0xe4] sm:$0xf]  ;;  %v919_v28 = vor.u32 %v1241_v18, %v918_v17 }
  0x16   :  { %v1016_v27 = vld [vmem:[%s1914_s3 + $0xe8] sm:$0xf0]  ;;  %v32_v29 = vld [vmem:[%s1915_s0] sm:$0xf]  ;;  %v983_v30 = vor.u32 %v1257_v22, %v982_v21  ;;  %v955_v31 = vor.u32 %v1248_v24, %v952_v25  ;;  %v1246_v33 = vld [vmem:[%s1914_s3 + $0x54] sm:$0xf] }
  0x17   :  { %379 = vmatpush.bf16.msra.mxu3 %v999_v2  ;;  %v1019_v32 = vor.u32 %v1264_v26, %v1016_v27  ;;  %v944_v34 = vld [vmem:[%s1914_s3 + $0x58] sm:$0xf0]  ;;  %v1262_v35 = vld [vmem:[%s1914_s3 + $0xd4] sm:$0xf]  ;;  %v1244_v39 = vld [vmem:[%s1914_s3 + $0x44] sm:$0xf] }
  0x18   :  { %140 = vmatpush.bf16.msra.mxu0 %v855_v51  ;;  %v1008_v36 = vld [vmem:[%s1914_s3 + $0xd8] sm:$0xf0]  ;;  %v947_v37 = vor.u32 %v1246_v33, %v944_v34  ;;  %v936_v40 = vld [vmem:[%s1914_s3 + $0x48] sm:$0xf0]  ;;  %v1260_v41 = vld [vmem:[%s1914_s3 + $0xc4] sm:$0xf] }
  0x19   :  { %153 = vmatpush.bf16.msra.mxu1 %v859_v56  ;;  %367 = vmatpush.bf16.msra.mxu2 %v927_v14  ;;  %v1011_v38 = vor.u32 %v1262_v35, %v1008_v36  ;;  %v1000_v42 = vld [vmem:[%s1914_s3 + $0xc8] sm:$0xf0]  ;;  %v939_v43 = vor.u32 %v1244_v39, %v936_v40  ;;  %v1242_v45 = vld [vmem:[%s1914_s3 + $0x34] sm:$0xf]  ;;  %v928_v46 = vld [vmem:[%s1914_s3 + $0x38] sm:$0xf0] }
  0x1a   :  { %v1003_v44 = vor.u32 %v1260_v41, %v1000_v42  ;;  %v1258_v47 = vld [vmem:[%s1914_s3 + $0xb4] sm:$0xf]  ;;  %v992_v48 = vld [vmem:[%s1914_s3 + $0xb8] sm:$0xf0]  ;;  %v931_v49 = vor.u32 %v1242_v45, %v928_v46  ;;  %v1240_v51 = vld [vmem:[%s1914_s3 + $0x24] sm:$0xf] }
  0x1b   :  { %380 = vmatpush.bf16.msra.mxu3 %v991_v16  ;;  %v995_v50 = vor.u32 %v1258_v47, %v992_v48  ;;  %v920_v52 = vld [vmem:[%s1914_s3 + $0x28] sm:$0xf0]  ;;  %v1256_v53 = vld [vmem:[%s1914_s3 + $0xa4] sm:$0xf]  ;;  %v910_v57 = vld [vmem:[%s1914_s3 + $0x10] sm:$0xf] }
  0x1c   :  { %141 = vmatpush.bf16.msra.mxu0 %v847_v0  ;;  %v984_v54 = vld [vmem:[%s1914_s3 + $0xa8] sm:$0xf0]  ;;  %v923_v55 = vor.u32 %v1240_v51, %v920_v52  ;;  %v1239_v58 = vld [vmem:[%s1914_s3 + $0x14] sm:$0xf0]  ;;  %v974_v59 = vld [vmem:[%s1914_s3 + $0x90] sm:$0xf] }
  0x1d   :  { %154 = vmatpush.bf16.msra.mxu1 %v851_v5  ;;  %368 = vmatpush.bf16.msra.mxu2 %v919_v28  ;;  %v987_v56 = vor.u32 %v1256_v53, %v984_v54  ;;  %v911_v60 = vor.u32 %v1239_v58, %v910_v57  ;;  %v1255_v61 = vld [vmem:[%s1914_s3 + $0x94] sm:$0xf0]  ;;  %v1238_v62 = vld [vmem:[%s1914_s3 + $0x14] sm:$0xf]  ;;  %v912_v63 = vld [vmem:[%s1914_s3 + $0x18] sm:$0xf0] }
  0x1e   :  { %v975_v0 = vor.u32 %v1255_v61, %v974_v59  ;;  %v915_v1 = vor.u32 %v1238_v62, %v912_v63  ;;  %v1254_v2 = vld [vmem:[%s1914_s3 + $0x94] sm:$0xf]  ;;  %v976_v3 = vld [vmem:[%s1914_s3 + $0x98] sm:$0xf0]  ;;  %v902_v5 = vld [vmem:[%s1914_s3] sm:$0xf] }
  0x1f   :  { %381 = vmatpush.bf16.msra.mxu3 %v983_v30  ;;  %v979_v4 = vor.u32 %v1254_v2, %v976_v3  ;;  %v1237_v6 = vld [vmem:[%s1914_s3 + $0x4] sm:$0xf0]  ;;  %v966_v7 = vld [vmem:[%s1914_s3 + $0x80] sm:$0xf]  ;;  %v1236_v10 = vld [vmem:[%s1914_s3 + $0x4] sm:$0xf] }
  0x20   :  { %142 = vmatpush.bf16.msra.mxu0 %v839_v15  ;;  %v903_v8 = vor.u32 %v1237_v6, %v902_v5  ;;  %v1253_v9 = vld [vmem:[%s1914_s3 + $0x84] sm:$0xf0]  ;;  %v904_v11 = vld [vmem:[%s1914_s3 + $0x8] sm:$0xf0]  ;;  %v1252_v14 = vld [vmem:[%s1914_s3 + $0x84] sm:$0xf] }
  0x21   :  { %155 = vmatpush.bf16.msra.mxu1 %v843_v19  ;;  %369 = vmatpush.bf16.msra.mxu2 %v911_v60  ;;  %v967_v12 = vor.u32 %v1253_v9, %v966_v7  ;;  %v907_v13 = vor.u32 %v1236_v10, %v904_v11  ;;  %v968_v15 = vld [vmem:[%s1914_s3 + $0x88] sm:$0xf0]  ;;  %v1150_v17 = vld [vmem:[%s1916_s5 + $0xf0] sm:$0xf]  ;;  %v1299_v18 = vld [vmem:[%s1916_s5 + $0xf4] sm:$0xf0] }
  0x22   :  { %v971_v16 = vor.u32 %v1252_v14, %v968_v15  ;;  %v1298_v19 = vld [vmem:[%s1916_s5 + $0xf4] sm:$0xf]  ;;  %v1152_v21 = vld [vmem:[%s1916_s5 + $0xf8] sm:$0xf0]  ;;  %v1142_v22 = vld [vmem:[%s1916_s5 + $0xe0] sm:$0xf] }
  0x23   :  { %143 = vmatmul.bf16.vlgmr.msra.gmra.mxu0 %v32_v29  ;;  %382 = vmatpush.bf16.msra.mxu3 %v975_v0  ;;  %v1155_v24 = vor.u32 %v1298_v19, %v1152_v21  ;;  %v1296_v25 = vld [vmem:[%s1916_s5 + $0xe4] sm:$0xf]  ;;  %v1144_v26 = vld [vmem:[%s1916_s5 + $0xe8] sm:$0xf0]  ;;  %v1086_v27 = vld [vmem:[%s1916_s5 + $0x70] sm:$0xf] }
  0x24   :  { %389 = vmatpush.bf16.msrb.mxu0 %v963_v20  ;;  %156 = vmatmul.bf16.vlgmr.msra.gmra.mxu1 %v32_v29  ;;  %v1151_v20 = vor.u32 %v1299_v18, %v1150_v17  ;;  %v1283_v29 = vld [vmem:[%s1916_s5 + $0x74] sm:$0xf0]  ;;  %v1282_v30 = vld [vmem:[%s1916_s5 + $0x74] sm:$0xf]  ;;  %v1134_v35 = vld [vmem:[%s1916_s5 + $0xd0] sm:$0xf] }
  0x25   :  { %402 = vmatpush.bf16.msrb.mxu1 %v1027_v23  ;;  %370 = vmatpush.bf16.msra.mxu2 %v903_v8  ;;  %v1297_v23 = vld [vmem:[%s1916_s5 + $0xe4] sm:$0xf0]  ;;  %v1087_v33 = vor.u32 %v1283_v29, %v1086_v27  ;;  %v1295_v36 = vld [vmem:[%s1916_s5 + $0xd4] sm:$0xf0]  ;;  %v1078_v39 = vld [vmem:[%s1916_s5 + $0x60] sm:$0xf] }
  0x26   :  { %v1143_v28 = vor.u32 %v1297_v23, %v1142_v22  ;;  %v1281_v40 = vld [vmem:[%s1916_s5 + $0x64] sm:$0xf0]  ;;  %v1280_v42 = vld [vmem:[%s1916_s5 + $0x64] sm:$0xf]  ;;  %v1126_v46 = vld [vmem:[%s1916_s5 + $0xc0] sm:$0xf] }
  0x27   :  { %383 = vmatpush.bf16.msra.mxu3 %v967_v12  ;;  %v1079_v41 = vor.u32 %v1281_v40, %v1078_v39  ;;  %v1293_v47 = vld [vmem:[%s1916_s5 + $0xc4] sm:$0xf0]  ;;  %v1278_v51 = vld [vmem:[%s1916_s5 + $0x54] sm:$0xf]  ;;  %v1292_v52 = vld [vmem:[%s1916_s5 + $0xc4] sm:$0xf] }
  0x28   :  { %390 = vmatpush.bf16.msrb.mxu0 %v955_v31  ;;  %v1088_v31 = vld [vmem:[%s1916_s5 + $0x78] sm:$0xf0]  ;;  %v1128_v53 = vld [vmem:[%s1916_s5 + $0xc8] sm:$0xf0]  ;;  %v1062_v57 = vld [vmem:[%s1916_s5 + $0x40] sm:$0xf]  ;;  %v1127_v58 = vor.u32 %v1293_v47, %v1126_v46 }
  0x29   :  { %403 = vmatpush.bf16.msrb.mxu1 %v1019_v32  ;;  %v1147_v32 = vor.u32 %v1296_v25, %v1144_v26  ;;  %v1091_v34 = vor.u32 %v1282_v30, %v1088_v31  ;;  %617 = vmatpush.bf16.msrb.mxu2 %v1087_v33  ;;  %v1072_v54 = vld [vmem:[%s1916_s5 + $0x58] sm:$0xf0]  ;;  %v1277_v59 = vld [vmem:[%s1916_s5 + $0x44] sm:$0xf0]  ;;  %v1276_v60 = vld [vmem:[%s1916_s5 + $0x44] sm:$0xf]  ;;  %v1131_v62 = vor.u32 %v1292_v52, %v1128_v53 }
  0x2a   :  { %v1064_v61 = vld [vmem:[%s1916_s5 + $0x48] sm:$0xf0]  ;;  %v1118_v63 = vld [vmem:[%s1916_s5 + $0xb0] sm:$0xf]  ;;  %v1291_v0 = vld [vmem:[%s1916_s5 + $0xb4] sm:$0xf0]  ;;  %v1063_v3 = vor.u32 %v1277_v59, %v1062_v57 }
  0x2b   :  { %630 = vmatpush.bf16.msrb.mxu3 %v1151_v20  ;;  %v1120_v2 = vld [vmem:[%s1916_s5 + $0xb8] sm:$0xf0]  ;;  %v1119_v5 = vor.u32 %v1291_v0, %v1118_v63  ;;  %v1110_v7 = vld [vmem:[%s1916_s5 + $0xa0] sm:$0xf]  ;;  %v1289_v8 = vld [vmem:[%s1916_s5 + $0xa4] sm:$0xf0] }
  0x2c   :  { %391 = vmatpush.bf16.msrb.mxu0 %v947_v37  ;;  %v1294_v37 = vld [vmem:[%s1916_s5 + $0xd4] sm:$0xf]  ;;  %v49_v9 = vld [vmem:[%s1917_s2] sm:$0x3]  ;;  %v1288_v10 = vld [vmem:[%s1916_s5 + $0xa4] sm:$0xf]  ;;  %v1111_v12 = vor.u32 %v1289_v8, %v1110_v7 }
  0x2d   :  { %404 = vmatpush.bf16.msrb.mxu1 %v1011_v38  ;;  %v1136_v38 = vld [vmem:[%s1916_s5 + $0xd8] sm:$0xf0]  ;;  %618 = vmatpush.bf16.msrb.mxu2 %v1079_v41  ;;  %v1112_v11 = vld [vmem:[%s1916_s5 + $0xa8] sm:$0xf0]  ;;  %v52_v15 = vperm.slane %v49_v9, 1  ;;  %v1314_v0 = vld [vmem:[%s1918_s7 + $0x70] sm:$0xff] }
  0x2e   :  { %v1139_v48 = vor.u32 %v1294_v37, %v1136_v38  ;;  %v1115_v14 = vor.u32 %v1288_v10, %v1112_v11  ;;  %v1054_v26 = vld [vmem:[%s1916_s5 + $0x30] sm:$0xf]  ;;  %v1275_v27 = vld [vmem:[%s1916_s5 + $0x34] sm:$0xf0]  ;;  %v1056_v30 = vld [vmem:[%s1916_s5 + $0x38] sm:$0xf0] }
  0x2f   :  { %631 = vmatpush.bf16.msrb.mxu3 %v1143_v28  ;;  %v1274_v28 = vld [vmem:[%s1916_s5 + $0x34] sm:$0xf]  ;;  %v1055_v29 = vor.u32 %v1275_v27, %v1054_v26  ;;  %v1287_v33 = vld [vmem:[%s1916_s5 + $0x94] sm:$0xf0]  ;;  %v1046_v38 = vld [vmem:[%s1916_s5 + $0x20] sm:$0xf] }
  0x30   :  { %392 = vmatpush.bf16.msrb.mxu0 %v939_v43  ;;  %v1080_v43 = vld [vmem:[%s1916_s5 + $0x68] sm:$0xf0]  ;;  %v1059_v31 = vor.u32 %v1274_v28, %v1056_v30  ;;  %v1273_v39 = vld [vmem:[%s1916_s5 + $0x24] sm:$0xf0]  ;;  %v1272_v40 = vld [vmem:[%s1916_s5 + $0x24] sm:$0xf] }
  0x31   :  { %405 = vmatpush.bf16.msrb.mxu1 %v1003_v44  ;;  %v1135_v44 = vor.u32 %v1295_v36, %v1134_v35  ;;  %v1083_v45 = vor.u32 %v1280_v42, %v1080_v43  ;;  %v1104_v36 = vld [vmem:[%s1916_s5 + $0x98] sm:$0xf0]  ;;  %v1047_v41 = vor.u32 %v1273_v39, %v1046_v38  ;;  %v1048_v42 = vld [vmem:[%s1916_s5 + $0x28] sm:$0xf0]  ;;  %v1284_v46 = vld [vmem:[%s1916_s5 + $0x84] sm:$0xf] }
  0x32   :  { %v1051_v43 = vor.u32 %v1272_v40, %v1048_v42  ;;  %v1270_v53 = vld [vmem:[%s1916_s5 + $0x14] sm:$0xf]  ;;  %v1269_v57 = vld [vmem:[%s1916_s5 + $0x4] sm:$0xf0]  ;;  %v1307_v63 = vld [vmem:[%s1918_s7 + $0x38] sm:$0xff] }
  0x33   :  { %632 = vmatpush.bf16.msrb.mxu3 %v1135_v44  ;;  %v1094_v44 = vld [vmem:[%s1916_s5 + $0x80] sm:$0xf]  ;;  %v1310_v26 = vld [vmem:[%s1918_s7 + $0x50] sm:$0xff]  ;;  %v1303_v27 = vld [vmem:[%s1918_s7 + $0x18] sm:$0xff] }
  0x34   :  { %393 = vmatpush.bf16.msrb.mxu0 %v931_v49  ;;  %v1070_v49 = vld [vmem:[%s1916_s5 + $0x50] sm:$0xf]  ;;  %v1309_v28 = vld [vmem:[%s1918_s7 + $0x48] sm:$0xff]  ;;  %v1308_v30 = vld [vmem:[%s1918_s7 + $0x40] sm:$0xff] }
  0x35   :  { %406 = vmatpush.bf16.msrb.mxu1 %v995_v50  ;;  %v1279_v50 = vld [vmem:[%s1916_s5 + $0x54] sm:$0xf0] }
  0x37   :  { %633 = vmatpush.bf16.msrb.mxu3 %v1127_v58  ;;  %v1268_v58 = vld [vmem:[%s1916_s5 + $0x4] sm:$0xf] }
  0x38   :  { %394 = vmatpush.bf16.msrb.mxu0 %v923_v55  ;;  %v1071_v55 = vor.u32 %v1279_v50, %v1070_v49  ;;  %v1038_v50 = vld [vmem:[%s1916_s5 + $0x10] sm:$0xf] }
  0x39   :  { %407 = vmatpush.bf16.msrb.mxu1 %v987_v56  ;;  %v1075_v56 = vor.u32 %v1278_v51, %v1072_v54  ;;  %v1271_v51 = vld [vmem:[%s1916_s5 + $0x14] sm:$0xf0]  ;;  %v1040_v54 = vld [vmem:[%s1916_s5 + $0x18] sm:$0xf0] }
  0x3a   :  { %619 = vmatpush.bf16.msrb.mxu2 %v1071_v55  ;;  %v1039_v52 = vor.u32 %v1271_v51, %v1038_v50  ;;  %v1043_v55 = vor.u32 %v1270_v53, %v1040_v54  ;;  %v1316_v53 = vld [vmem:[%s1921_s8] ss:$0 sm:$0xff] }
  0x3b   :  { %634 = vmatpush.bf16.msrb.mxu3 %v1119_v5  ;;  %v197_v5 = vld [vmem:[%s1919_s4] sm:$0x3] }
  0x3c   :  { %395 = vmatpush.bf16.msrb.mxu0 %v915_v1  ;;  %v1290_v1 = vld [vmem:[%s1916_s5 + $0xb4] sm:$0xf]  ;;  %v199_v11 = vperm.slane %v197_v5, 0 }
  0x3d   :  { %408 = vmatpush.bf16.msrb.mxu1 %v979_v4  ;;  %v1067_v4 = vor.u32 %v1276_v60, %v1064_v61  ;;  %v1123_v6 = vor.u32 %v1290_v1, %v1120_v2  ;;  %v1032_v60 = vld [vmem:[%s1916_s5 + $0x8] sm:$0xf0]  ;;  %v1306_v1 = vld [vmem:[%s1918_s7 + $0x30] sm:$0xff] }
  0x3e   :  { %620 = vmatpush.bf16.msrb.mxu2 %v1063_v3  ;;  %v1035_v61 = vor.u32 %v1268_v58, %v1032_v60  ;;  %v1313_v2 = vld [vmem:[%s1918_s7 + $0x68] sm:$0xff] }
  0x3f   :  { %635 = vmatpush.bf16.msrb.mxu3 %v1111_v12  ;;  %v1305_v3 = vld [vmem:[%s1918_s7 + $0x28] sm:$0xff] }
  0x40   :  { %396 = vmatpush.bf16.msrb.mxu0 %v907_v13  ;;  %v51_v13 = vperm.slane %v49_v9, 0 }
  0x41   :  { %409 = vmatpush.bf16.msrb.mxu1 %v971_v16 }
  0x42   :  { %621 = vmatpush.bf16.msrb.mxu2 %v1055_v29  ;;  %v1302_v29 = vld [vmem:[%s1918_s7 + $0x10] sm:$0xff] }
  0x44   :  { %643 = vmatpush.bf16.msra.mxu0 %v1091_v34  ;;  %v1286_v34 = vld [vmem:[%s1916_s5 + $0x94] sm:$0xf] }
  0x45   :  { %656 = vmatpush.bf16.msra.mxu1 %v1155_v24  ;;  %v1107_v37 = vor.u32 %v1286_v34, %v1104_v36  ;;  %v451_v34 = vld [vmem:[%s1920_s6] sm:$0x3] }
  0x46   :  { %622 = vmatpush.bf16.msrb.mxu2 %v1047_v41  ;;  %v453_v41 = vperm.slane %v451_v34, 0 }
  0x48   :  { %644 = vmatpush.bf16.msra.mxu0 %v1083_v45  ;;  %v1285_v45 = vld [vmem:[%s1916_s5 + $0x84] sm:$0xf0] }
  0x49   :  { %657 = vmatpush.bf16.msra.mxu1 %v1147_v32  ;;  %v1102_v32 = vld [vmem:[%s1916_s5 + $0x90] sm:$0xf]  ;;  %v1095_v47 = vor.u32 %v1285_v45, %v1094_v44 }
  0x4a   :  { %v1103_v35 = vor.u32 %v1287_v33, %v1102_v32  ;;  %623 = vmatpush.bf16.msrb.mxu2 %v1039_v52  ;;  %v1300_v32 = vld [vmem:[%s1918_s7] sm:$0xff] }
  0x4c   :  { %645 = vmatpush.bf16.msra.mxu0 %v1075_v56  ;;  %636 = vmatpush.bf16.msrb.mxu3 %v1103_v35  ;;  %v1030_v56 = vld [vmem:[%s1916_s5] sm:$0xf]  ;;  %v454_v35 = vperm.slane %v451_v34, 1 }
  0x4d   :  { %658 = vmatpush.bf16.msra.mxu1 %v1139_v48  ;;  %v1096_v48 = vld [vmem:[%s1916_s5 + $0x88] sm:$0xf0]  ;;  %v1031_v59 = vor.u32 %v1269_v57, %v1030_v56 }
  0x4e   :  { %v1099_v49 = vor.u32 %v1284_v46, %v1096_v48 }
  0x4f   :  { %624 = vmatpush.bf16.msrb.mxu2 %v1031_v59 }
  0x50   :  { %646 = vmatpush.bf16.msra.mxu0 %v1067_v4  ;;  %637 = vmatpush.bf16.msrb.mxu3 %v1095_v47  ;;  %v1312_v4 = vld [vmem:[%s1918_s7 + $0x60] sm:$0xff] }
  0x51   :  { %659 = vmatpush.bf16.msra.mxu1 %v1131_v62  ;;  %v1315_v62 = vld [vmem:[%s1918_s7 + $0x78] sm:$0xff] }
  0x54   :  { %647 = vmatpush.bf16.msra.mxu0 %v1059_v31  ;;  %v1301_v31 = vld [vmem:[%s1918_s7 + $0x8] sm:$0xff] }
  0x55   :  { %660 = vmatpush.bf16.msra.mxu1 %v1123_v6  ;;  %v200_v6 = vperm.slane %v197_v5, 1 }
  0x58   :  { %648 = vmatpush.bf16.msra.mxu0 %v1051_v43 }
  0x59   :  { %661 = vmatpush.bf16.msra.mxu1 %v1115_v14 }
  0x5c   :  { %649 = vmatpush.bf16.msra.mxu0 %v1043_v55 }
  0x5d   :  { %662 = vmatpush.bf16.msra.mxu1 %v1107_v37 }
  0x60   :  { %650 = vmatpush.bf16.msra.mxu0 %v1035_v61 }
  0x61   :  { %663 = vmatpush.bf16.msra.mxu1 %v1099_v49 }
  0xa0   :  { %v144_v16 = vpop.f32.mrf.mxu0 }
  0xa1   :  { %v145_v17 = vadd.f32 %v144_v16, %v51_v13  ;;  %v157_v18 = vpop.f32.mrf.mxu1 }
  0xa2   :  { %v158_v19 = vadd.f32 %v157_v18, %v52_v15 }
  0xa3   :  { %v161_v20 = vmax.f32 %v145_v17, 0.0 }
  0xa4   :  { %v162_v21 = vmax.f32 %v158_v19, 0.0 }
  0xa5   :  { %v163_v22 = vpack.c.bf16 %v161_v20, %v161_v20 }
  0xa6   :  { %v164_v23 = vpack.c.bf16 %v162_v21, %v162_v21 }
  0xa7   :  { %371 = vmatmul.bf16.vlgmr.msra.gmra.mxu2 %v163_v22  ;;  %397 = vmatmul.bf16.vlgmr.msrb.gmra.mxu0 %v163_v22 }
  0xa8   :  { %384 = vmatmul.bf16.vlgmr.msra.gmra.mxu3 %v164_v23  ;;  %410 = vmatmul.bf16.vlgmr.msrb.gmra.mxu1 %v164_v23  ;;  %v146_v24 = vpop.f32.mrf.mxu0 }
  0xa9   :  { %v159_v25 = vpop.f32.mrf.mxu1  ;;  %818 = vmatpush.bf16.msra.mxu3 %v1315_v62  ;;  %805 = vmatpush.bf16.msra.mxu2 %v1307_v63  ;;  %v1311_v24 = vld [vmem:[%s1918_s7 + $0x58] sm:$0xff] }
  0xaa   :  { %v1304_v25 = vld [vmem:[%s1918_s7 + $0x20] sm:$0xff] }
  0xad   :  { %819 = vmatpush.bf16.msra.mxu3 %v1314_v0  ;;  %806 = vmatpush.bf16.msra.mxu2 %v1306_v1 }
  0xb1   :  { %820 = vmatpush.bf16.msra.mxu3 %v1313_v2  ;;  %807 = vmatpush.bf16.msra.mxu2 %v1305_v3 }
  0xb5   :  { %821 = vmatpush.bf16.msra.mxu3 %v1312_v4  ;;  %808 = vmatpush.bf16.msra.mxu2 %v1304_v25 }
  0xb9   :  { %822 = vmatpush.bf16.msra.mxu3 %v1311_v24  ;;  %809 = vmatpush.bf16.msra.mxu2 %v1303_v27 }
  0xbd   :  { %823 = vmatpush.bf16.msra.mxu3 %v1310_v26  ;;  %810 = vmatpush.bf16.msra.mxu2 %v1302_v29 }
  0xc1   :  { %824 = vmatpush.bf16.msra.mxu3 %v1309_v28  ;;  %811 = vmatpush.bf16.msra.mxu2 %v1301_v31 }
  0xc5   :  { %825 = vmatpush.bf16.msra.mxu3 %v1308_v30  ;;  %812 = vmatpush.bf16.msra.mxu2 %v1300_v32 }
 0x124   :  { %v398_v7 = vpop.f32.mrf.mxu0 }
 0x125   :  { %v399_v8 = vadd.f32 %v398_v7, %v200_v6  ;;  %v411_v9 = vpop.f32.mrf.mxu1 }
 0x127   :  { %v412_v10 = vadd.f32 %v411_v9, %v399_v8 }
 0x129   :  { %v416_v12 = vmax.f32 %v412_v10, 0.0 }
 0x12a   :  { %v372_v13 = vpop.f32.mrf.mxu2 }
 0x12b   :  { %v418_v14 = vpack.c.bf16 %v416_v12, %v416_v12  ;;  %v373_v15 = vadd.f32 %v372_v13, %v199_v11  ;;  %v385_v16 = vpop.f32.mrf.mxu3 }
 0x12c   :  { %v400_v17 = vpop.f32.mrf.mxu0 }
 0x12d   :  { %v386_v18 = vadd.f32 %v385_v16, %v373_v15  ;;  %v413_v19 = vpop.f32.mrf.mxu1  ;;  %638 = vmatmul.bf16.vlgmr.msrb.gmra.mxu3 %v418_v14  ;;  %664 = vmatmul.bf16.vlgmr.msra.gmra.mxu1 %v418_v14 }
 0x12f   :  { %v415_v20 = vmax.f32 %v386_v18, 0.0 }
 0x131   :  { %v417_v21 = vpack.c.bf16 %v415_v20, %v415_v20 }
 0x132   :  { %v374_v22 = vpop.f32.mrf.mxu2 }
 0x133   :  { %v387_v23 = vpop.f32.mrf.mxu3  ;;  %625 = vmatmul.bf16.vlgmr.msrb.gmra.mxu2 %v417_v21  ;;  %651 = vmatmul.bf16.vlgmr.msra.gmra.mxu0 %v417_v21 }
 0x1aa   :  { %v665_v33 = vpop.f32.mrf.mxu1 }
 0x1b0   :  { %v639_v36 = vpop.f32.mrf.mxu3  ;;  %v652_v37 = vpop.f32.mrf.mxu0 }
 0x1b1   :  { %v653_v38 = vadd.f32 %v652_v37, %v454_v35 }
 0x1b2   :  { %v667_v39 = vpop.f32.mrf.mxu1 }
 0x1b3   :  { %v666_v40 = vadd.f32 %v665_v33, %v653_v38 }
 0x1b5   :  { %v670_v42 = vmax.f32 %v666_v40, 0.0 }
 0x1b6   :  { %v626_v43 = vpop.f32.mrf.mxu2 }
 0x1b7   :  { %v672_v44 = vpack.c.bf16 %v670_v42, %v670_v42  ;;  %v627_v45 = vadd.f32 %v626_v43, %v453_v41 }
 0x1b8   :  { %v641_v46 = vpop.f32.mrf.mxu3  ;;  %v654_v47 = vpop.f32.mrf.mxu0 }
 0x1b9   :  { %v640_v48 = vadd.f32 %v639_v36, %v627_v45  ;;  %826 = vmatmul.bf16.vlgmr.msra.gmra.mxu3 %v672_v44 }
 0x1bb   :  { %v669_v49 = vmax.f32 %v640_v48, 0.0 }
 0x1bd   :  { %v671_v50 = vpack.c.bf16 %v669_v49, %v669_v49 }
 0x1be   :  { %v628_v51 = vpop.f32.mrf.mxu2 }
 0x1bf   :  { %813 = vmatmul.bf16.vlgmr.msra.gmra.mxu2 %v671_v50 }
 0x23c   :  { %v827_v52 = vpop.f32.mrf.mxu3 }
 0x242   :  { %v814_v54 = vpop.f32.mrf.mxu2 }
 0x243   :  { %v815_v55 = vadd.f32 %v1316_v53, %v814_v54 }
 0x244   :  { %v829_v56 = vpop.f32.mrf.mxu3 }
 0x245   :  { %v828_v57 = vadd.f32 %v827_v52, %v815_v55 }
 0x247   :  { %831 = vst [vmem:[%s1922_s9] sm:$0xff] %v828_v57 }
 0x24a   :  { %v816_v58 = vpop.f32.mrf.mxu2 }

</bundles_post_ra>
